<compile_context>
chip_gen: v6e
topology: v6e:2x2x1
jax: 0.10.0
libtpu: 0.0.40
codegen_flags: <defaults>
</compile_context>

<pallas_src>
import jax
import jax.numpy as jnp
from jax.experimental import pallas as pl
from jax.experimental.pallas import tpu as pltpu


def _round_up(x, m):
    return ((x + m - 1) // m) * m


def _nearest_embed_kernel(x_ref, e_ref, half_e2_ref, q_ref, idx_ref):
    # x_ref:       (TN, D)   streamed row tile (native dtype)
    # e_ref:       (Kp, D)   resident codebook, K padded to 128-multiple
    # half_e2_ref: (1, Kp)   resident 0.5*||e_k||^2 (f32, +inf on pad rows)
    x = x_ref[...]                                                    # (TN, D)
    e = e_ref[...]                                                    # (Kp, D)
    half_e2 = half_e2_ref[...]                                        # (1, Kp) f32

    # argmin_k ||x - e_k||^2 == argmin_k ( 0.5*||e_k||^2 - x . e_k )
    xe = jnp.dot(x, e.T, preferred_element_type=jnp.float32)          # (TN, Kp) MXU
    score = half_e2 - xe                                              # (TN, Kp) VPU

    idx = jnp.argmin(score, axis=1).astype(jnp.int32)                 # (TN,) XLU

    # Exact gather embeddings[idx] via one-hot matmul (0/1 rows are exact in
    # any matmul input dtype; accumulation is f32). Pad columns never win the
    # argmin and their codebook rows are zero, so they contribute nothing.
    tn, kp = score.shape
    cols = jax.lax.broadcasted_iota(jnp.int32, (tn, kp), 1)            # (TN, Kp)
    onehot = (cols == idx[:, None]).astype(e.dtype)                    # (TN, Kp)
    quant = jnp.dot(onehot, e, preferred_element_type=jnp.float32)     # (TN, D) MXU

    q_ref[...] = quant.astype(q_ref.dtype)
    idx_ref[...] = idx[None, :]                                        # lane-dense (1, TN)


def nearest_embed(x, embeddings, *, block_rows=1024):
    """Pallas forward of NearestEmbed.forward(x).

    x:          (..., embedding_dim) float array
    embeddings: (num_embeddings, embedding_dim) float array
    returns: (quantized with x's shape/dtype, encoding_indices int32 of shape (N,))
    """
    K, D = embeddings.shape
    flat = x.reshape(-1, D)
    N = flat.shape[0]

    # Row tile: multiple of 128 so the (1, TN) index block is lane-dense and
    # the (TN, D) blocks satisfy the (8, 128) sublane rule.
    tn = min(block_rows, _round_up(N, 128))
    n_pad = _round_up(N, tn)
    if n_pad != N:
        flat = jnp.pad(flat, ((0, n_pad - N), (0, 0)))

    # Pad the codebook axis to a lane-dense multiple of 128; pad rows are zero
    # and their (pre-halved) norms are +inf so they can never win the argmin.
    k_pad = _round_up(K, 128)
    e = embeddings
    half_e2 = 0.5 * jnp.sum(embeddings.astype(jnp.float32) ** 2, axis=1)
    if k_pad != K:
        e = jnp.pad(embeddings, ((0, k_pad - K), (0, 0)))
        half_e2 = jnp.concatenate(
            [half_e2, jnp.full((k_pad - K,), jnp.inf, dtype=jnp.float32)]
        )
    half_e2 = half_e2[None, :]                                          # (1, Kp)

    itemsize = jnp.dtype(x.dtype).itemsize
    cost = pl.CostEstimate(
        flops=4 * n_pad * k_pad * D,                   # dist matmul + one-hot gather
        transcendentals=0,
        bytes_accessed=(2 * n_pad * D * itemsize       # x read + quant write
                        + n_pad * 4                    # indices
                        + k_pad * D * itemsize + k_pad * 4),  # codebook + norms
    )

    grid = (n_pad // tn,)
    quant, idx = pl.pallas_call(
        _nearest_embed_kernel,
        out_shape=(
            jax.ShapeDtypeStruct((n_pad, D), x.dtype),
            jax.ShapeDtypeStruct((1, n_pad), jnp.int32),
        ),
        grid=grid,
        in_specs=[
            pl.BlockSpec((tn, D), lambda i: (i, 0)),      # streamed row tile
            pl.BlockSpec((k_pad, D), lambda i: (0, 0)),   # resident codebook
            pl.BlockSpec((1, k_pad), lambda i: (0, 0)),   # resident 0.5*||e||^2
        ],
        out_specs=(
            pl.BlockSpec((tn, D), lambda i: (i, 0)),      # quantized rows
            pl.BlockSpec((1, tn), lambda i: (0, i)),      # lane-dense indices
        ),
        compiler_params=pltpu.CompilerParams(
            dimension_semantics=("parallel",),            # shards tiles across TCs
            vmem_limit_bytes=32 * 1024 * 1024,
        ),
        cost_estimate=cost,
    )(flat, e, half_e2)

    quant = quant[:N].reshape(x.shape)
    idx = idx[0, :N]
    return quant, idx


def _reference(x, embeddings):
    D = embeddings.shape[1]
    flat = x.reshape(-1, D).astype(jnp.float32)
    e = embeddings.astype(jnp.float32)
    dist = (jnp.sum(flat * flat, axis=1, keepdims=True)
            + jnp.sum(e * e, axis=1)[None, :]
            - 2.0 * flat @ e.T)
    idx = jnp.argmin(dist, axis=1).astype(jnp.int32)
    quant = e[idx].astype(x.dtype).reshape(x.shape)
    return quant, idx


if __name__ == "__main__":
    num_embeddings = 64
    embedding_dim = 32

    key = jax.random.PRNGKey(0)
    k_emb, k_x = jax.random.split(key)

    # nn.Embedding weight init: uniform(-1/num_embeddings, 1/num_embeddings)
    embeddings = jax.random.uniform(
        k_emb, (num_embeddings, embedding_dim),
        minval=-1.0 / num_embeddings, maxval=1.0 / num_embeddings,
        dtype=jnp.float32,
    )

    # Small input: (batch=2, seq=8, hidden=embedding_dim) -> N = 16 flat rows.
    x = jax.random.normal(k_x, (2, 8, embedding_dim), dtype=jnp.float32)

    quant, idx = nearest_embed(x, embeddings)
    quant = jax.block_until_ready(quant)
    idx = jax.block_until_ready(idx)

    q_ref, idx_ref = _reference(x, embeddings)
    assert quant.shape == x.shape and quant.dtype == x.dtype
    assert idx.shape == (x.size // embedding_dim,)
    assert jnp.all(idx == idx_ref), "index mismatch vs reference"
    assert jnp.allclose(quant, q_ref, atol=1e-5), "quantized mismatch vs reference"

    # TODO(synk): weight_sg straight-through only affects gradients, not the
    # forward value, so it is intentionally not represented in the kernel.

    print("KERNEL_OK")
</pallas_src>

<mosaic_0001>
module attributes {stable_mosaic.version = 11 : i64} {
  func.func @_nearest_embed_kernel(%arg0: i32, %arg1: memref<128x32xf32, #tpu.memory_space<vmem>>, %arg2: memref<128x32xf32, #tpu.memory_space<vmem>>, %arg3: memref<1x128xf32, #tpu.memory_space<vmem>>, %arg4: memref<128x32xf32, #tpu.memory_space<vmem>>, %arg5: memref<1x128xi32, #tpu.memory_space<vmem>>) attributes {dimension_semantics = [#tpu.dimension_semantics<parallel>], iteration_bounds = array<i64: 1>, scalar_prefetch = 0 : i64, scratch_operands = 0 : i64, tpu.core_type = #tpu.core_type<tc>, window_params = [{transform_indices = @transform_0, window_bounds = array<i64: 128, 32>}, {pipeline_mode = #tpu.pipeline_mode<synchronous>, transform_indices = @transform_1, window_bounds = array<i64: 128, 32>}, {pipeline_mode = #tpu.pipeline_mode<synchronous>, transform_indices = @transform_2, window_bounds = array<i64: 1, 128>}, {transform_indices = @transform_3, window_bounds = array<i64: 128, 32>}, {transform_indices = @transform_4, window_bounds = array<i64: 1, 128>}]} {
    %c0 = arith.constant 0 : index
    %c0_0 = arith.constant 0 : index
    %0 = vector.load %arg1[%c0, %c0_0] : memref<128x32xf32, #tpu.memory_space<vmem>>, vector<128x32xf32>
    %c0_1 = arith.constant 0 : index
    %c0_2 = arith.constant 0 : index
    %1 = vector.load %arg2[%c0_1, %c0_2] : memref<128x32xf32, #tpu.memory_space<vmem>>, vector<128x32xf32>
    %c0_3 = arith.constant 0 : index
    %c0_4 = arith.constant 0 : index
    %2 = vector.load %arg3[%c0_3, %c0_4] : memref<1x128xf32, #tpu.memory_space<vmem>>, vector<1x128xf32>
    %3 = tpu.transpose %1, [1, 0] : vector<128x32xf32> -> vector<32x128xf32>
    %cst = arith.constant dense<0.000000e+00> : vector<128x128xf32>
    %4 = tpu.matmul %0, %3, %cst {dimension_numbers = #tpu.dot_dimension_numbers<[1], [0], [0], [1], [0, 0, 1, 1], [], []>} : vector<128x32xf32>, vector<32x128xf32>, vector<128x128xf32> -> vector<128x128xf32>
    %5 = vector.broadcast %2 : vector<1x128xf32> to vector<128x128xf32>
    %6 = arith.subf %5, %4 : vector<128x128xf32>
    %7 = tpu.reduce_index %6 {axis = 1 : i32, kind = #tpu.reduction_kind<arg_min>} : vector<128x128xf32> -> vector<128xi32>
    %8 = tpu.iota {dimensions = array<i32: 1>} : vector<128x128xi32>
    %9 = vector.shape_cast %7 : vector<128xi32> to vector<128x1xi32>
    %10 = vector.broadcast %9 : vector<128x1xi32> to vector<128x128xi32>
    %11 = arith.cmpi eq, %8, %10 : vector<128x128xi32>
    %12 = arith.extui %11 : vector<128x128xi1> to vector<128x128xi32>
    %13 = arith.sitofp %12 : vector<128x128xi32> to vector<128x128xf32>
    %cst_5 = arith.constant dense<0.000000e+00> : vector<128x32xf32>
    %14 = tpu.matmul %13, %1, %cst_5 {dimension_numbers = #tpu.dot_dimension_numbers<[1], [0], [0], [1], [0, 0, 1, 1], [], []>} : vector<128x128xf32>, vector<128x32xf32>, vector<128x32xf32> -> vector<128x32xf32>
    %c0_6 = arith.constant 0 : index
    %c0_7 = arith.constant 0 : index
    %15 = vector.load %arg4[%c0_6, %c0_7] : memref<128x32xf32, #tpu.memory_space<vmem>>, vector<128x32xf32>
    tpu.vector_store %arg4[%c0_6, %c0_7], %14 {strides = array<i32>} : memref<128x32xf32, #tpu.memory_space<vmem>>, vector<128x32xf32>,
    %16 = vector.shape_cast %7 : vector<128xi32> to vector<1x128xi32>
    %c0_8 = arith.constant 0 : index
    %c0_9 = arith.constant 0 : index
    %17 = vector.load %arg5[%c0_8, %c0_9] : memref<1x128xi32, #tpu.memory_space<vmem>>, vector<1x128xi32>
    tpu.vector_store %arg5[%c0_8, %c0_9], %16 {strides = array<i32>} : memref<1x128xi32, #tpu.memory_space<vmem>>, vector<1x128xi32>,
    return
  }
  func.func @transform_0(%arg0: i32) -> (i32, i32) {
    %c0_i32 = arith.constant 0 : i32
    %c0_i32_0 = arith.constant 0 : i32
    return %arg0, %c0_i32 : i32, i32
  }
  func.func @transform_1(%arg0: i32) -> (i32, i32) {
    %c0_i32 = arith.constant 0 : i32
    %c0_i32_0 = arith.constant 0 : i32
    %c0_i32_1 = arith.constant 0 : i32
    return %c0_i32, %c0_i32_0 : i32, i32
  }
  func.func @transform_2(%arg0: i32) -> (i32, i32) {
    %c0_i32 = arith.constant 0 : i32
    %c0_i32_0 = arith.constant 0 : i32
    %c0_i32_1 = arith.constant 0 : i32
    return %c0_i32, %c0_i32_0 : i32, i32
  }
  func.func @transform_3(%arg0: i32) -> (i32, i32) {
    %c0_i32 = arith.constant 0 : i32
    %c0_i32_0 = arith.constant 0 : i32
    return %arg0, %c0_i32 : i32, i32
  }
  func.func @transform_4(%arg0: i32) -> (i32, i32) {
    %c0_i32 = arith.constant 0 : i32
    %c0_i32_0 = arith.constant 0 : i32
    return %c0_i32, %arg0 : i32, i32
  }
}

</mosaic_0001>

<bundles_post_ra>
// kernel: tpu_custom_call.1
= control target key start
LH: loop header
LB: loop body
LE: loop exit
PB: predicated region body
PF: predicated region fallthrough
CT: control target
= control target key end

     0   :  { %vm50_vm0 = vcmask 261120   ;;  %s1259_s0 = inlined_call_operand.vmem [shape: f32[128,32], index: 0, kind: input, shape index: {}]   ;;  %s1260_s1 = inlined_call_operand.vmem [shape: f32[128,32], index: 1, kind: input, shape index: {}]   ;;  %s1261_s2 = inlined_call_operand.vmem [shape: f32[1,128], index: 2, kind: input, shape index: {}]   ;;  %s1262_s3 = inlined_call_operand.vmem [shape: f32[128,32], index: 3, kind: output, shape index: {0}]   ;;  %s1263_s4 = inlined_call_operand.hbm [shape: s32[1,128], index: 4, kind: output, shape index: {1}]  }
   0x1   :  { %v48_v0 = vld [vmem:[%s1260_s1 + $0x78] sm:$0xff]  ;;  %v47_v1 = vld [vmem:[%s1260_s1 + $0x70] sm:$0xff]  ;;  %v46_v2 = vld [vmem:[%s1260_s1 + $0x68] sm:$0xff] }
   0x2   :  { %814 = vmatprep.subr.msk.mxu0 %vm50_vm0, %v48_v0  ;;  %870 = vmatprep.subr.mxu1 %v48_v0  ;;  %v17_v3 = vld [vmem:[%s1259_s0] sm:$0xff]  ;;  %v44_v5 = vld [vmem:[%s1260_s1 + $0x58] sm:$0xff]  ;;  %v43_v6 = vld [vmem:[%s1260_s1 + $0x50] sm:$0xff] }
   0x3   :  { %815 = vmatpush3.xpose.msk.msra.mxu0 %vm50_vm0, %v48_v0  ;;  %871 = vmatpush3.msra.mxu1 %v48_v0  ;;  %v45_v4 = vld [vmem:[%s1260_s1 + $0x60] sm:$0xff] }
   0x4   :  { %816 = vmatprep.subr.msk.mxu0 %vm50_vm0, %v47_v1  ;;  %872 = vmatprep.subr.mxu1 %v47_v1 }
   0x5   :  { %873 = vmatpush3.msra.mxu1 %v47_v1  ;;  %846 = vmatprep.mubr.msk.f32.mxu0 %vm50_vm0, %v17_v3 }
   0x6   :  { %874 = vmatprep.subr.mxu1 %v46_v2 }
   0x7   :  { %817 = vmatpush3.xpose.msk.msra.mxu0 %vm50_vm0, %v47_v1  ;;  %875 = vmatpush3.msra.mxu1 %v46_v2 }
   0x8   :  { %818 = vmatprep.subr.msk.mxu0 %vm50_vm0, %v46_v2  ;;  %876 = vmatprep.subr.mxu1 %v45_v4 }
   0x9   :  { %877 = vmatpush3.msra.mxu1 %v45_v4 }
   0xa   :  { %878 = vmatprep.subr.mxu1 %v44_v5 }
   0xb   :  { %819 = vmatpush3.xpose.msk.msra.mxu0 %vm50_vm0, %v46_v2  ;;  %879 = vmatpush3.msra.mxu1 %v44_v5 }
   0xc   :  { %820 = vmatprep.subr.msk.mxu0 %vm50_vm0, %v45_v4 }
   0xd   :  { %10 = vsyncpa [#allocation3], 0  ;;  %880 = vmatprep.subr.mxu1 %v43_v6  ;;  %v42_v7 = vld [vmem:[%s1260_s1 + $0x48] sm:$0xff]  ;;  %v41_v8 = vld [vmem:[%s1260_s1 + $0x40] sm:$0xff]  ;;  %v346_v1 = vlaneseq  ;;  %vm566_vm2 = vcmask 130112   ;;  %vm573_vm5 = vcmask 195712  }
   0xe   :  { %881 = vmatpush3.msra.mxu1 %v43_v6  ;;  %v40_v9 = vld [vmem:[%s1260_s1 + $0x38] sm:$0xff]  ;;  %v39_v10 = vld [vmem:[%s1260_s1 + $0x30] sm:$0xff]  ;;  %v38_v11 = vld [vmem:[%s1260_s1 + $0x28] sm:$0xff]  ;;  %vm580_vm6 = vcmask 261312   ;;  %vm587_vm9 = vcmask 326912   ;;  %vm594_vm10 = vcmask 392512  }
   0xf   :  { %821 = vmatpush3.xpose.msk.msra.mxu0 %vm50_vm0, %v45_v4  ;;  %882 = vmatprep.subr.mxu1 %v42_v7  ;;  %v37_v12 = vld [vmem:[%s1260_s1 + $0x20] sm:$0xff]  ;;  %v36_v13 = vld [vmem:[%s1260_s1 + $0x18] sm:$0xff]  ;;  %v35_v14 = vld [vmem:[%s1260_s1 + $0x10] sm:$0xff]  ;;  %v1124_v2 = vand.u32 127, %v346_v1  ;;  %v1126_v3 = vshrl.u32 %v346_v1, 7  ;;  %vm601_vm13 = vcmask 458112  }
  0x10   :  { %822 = vmatprep.subr.msk.mxu0 %vm50_vm0, %v44_v5  ;;  %883 = vmatpush3.msra.mxu1 %v42_v7  ;;  %v34_v15 = vld [vmem:[%s1260_s1 + $0x8] sm:$0xff]  ;;  %v33_v16 = vld [vmem:[%s1260_s1] sm:$0xff]  ;;  %v19_v18 = vld [vmem:[%s1259_s0 + $0x10] sm:$0xff]  ;;  %vm608_vm14 = vcmask 523712  }
  0x11   :  { %884 = vmatprep.subr.mxu1 %v41_v8  ;;  %v18_v17 = vld [vmem:[%s1259_s0 + $0x8] sm:$0xff]  ;;  %v20_v19 = vld [vmem:[%s1259_s0 + $0x18] sm:$0xff]  ;;  %v21_v20 = vld [vmem:[%s1259_s0 + $0x20] sm:$0xff]  ;;  %v561_v4 = vadd.s32 4294967288, %v1124_v2 }
  0x12   :  { %885 = vmatpush3.msra.mxu1 %v41_v8  ;;  %v22_v21 = vld [vmem:[%s1259_s0 + $0x28] sm:$0xff]  ;;  %v23_v22 = vld [vmem:[%s1259_s0 + $0x30] sm:$0xff]  ;;  %v24_v23 = vld [vmem:[%s1259_s0 + $0x38] sm:$0xff] }
  0x13   :  { %823 = vmatpush3.xpose.msk.msra.mxu0 %vm50_vm0, %v44_v5  ;;  %886 = vmatprep.subr.mxu1 %v40_v9  ;;  %v25_v24 = vld [vmem:[%s1259_s0 + $0x40] sm:$0xff]  ;;  %v26_v25 = vld [vmem:[%s1259_s0 + $0x48] sm:$0xff]  ;;  %v27_v26 = vld [vmem:[%s1259_s0 + $0x50] sm:$0xff]  ;;  %v568_v5 = vadd.s32 4294967280, %v1124_v2 }
  0x14   :  { %824 = vmatprep.subr.msk.mxu0 %vm50_vm0, %v43_v6  ;;  %887 = vmatpush3.msra.mxu1 %v40_v9  ;;  %v28_v27 = vld [vmem:[%s1259_s0 + $0x58] sm:$0xff]  ;;  %v29_v28 = vld [vmem:[%s1259_s0 + $0x60] sm:$0xff]  ;;  %v30_v29 = vld [vmem:[%s1259_s0 + $0x68] sm:$0xff] }
  0x15   :  { %888 = vmatprep.subr.mxu1 %v39_v10  ;;  %v31_v30 = vld [vmem:[%s1259_s0 + $0x70] sm:$0xff]  ;;  %v32_v31 = vld [vmem:[%s1259_s0 + $0x78] sm:$0xff]  ;;  %v717_v33 = vld [vmem:[%s1261_s2] ss:$0 sm:$0xff]  ;;  %s951_s0 = smov [#allocation2]  }
  0x16   :  { %889 = vmatpush3.msra.mxu1 %v39_v10  ;;  %s675_s2 = sshll.u32 %s951_s0, 4  ;;  %s676_s2 = int_to_ptr.vmem [resolvable:$true] %s675_s2 }
  0x17   :  { %825 = vmatpush3.xpose.msk.msra.mxu0 %vm50_vm0, %v43_v6  ;;  %890 = vmatprep.subr.mxu1 %v38_v11  ;;  %s928_s27 = scalar_lea.vmem %s676_s2, 16  ;;  %s932_s28 = scalar_lea.vmem %s676_s2, 32 }
  0x18   :  { %826 = vmatprep.subr.msk.mxu0 %vm50_vm0, %v42_v7  ;;  %891 = vmatpush3.msra.mxu1 %v38_v11  ;;  %p929_p0 = scmp.ne.s32.totalorder %s676_s2, %s928_s27  ;;  %p933_p1 = scmp.lt.s32.totalorder %s676_s2, %s676_s2 }
  0x19   :  { %892 = vmatprep.subr.mxu1 %v37_v12  ;;  %p934_p2 = scmp.lt.s32.totalorder %s932_s28, %s928_s27 }
  0x1a   :  { %893 = vmatpush3.msra.mxu1 %v37_v12 }
  0x1b   :  { %827 = vmatpush3.xpose.msk.msra.mxu0 %vm50_vm0, %v42_v7  ;;  %894 = vmatprep.subr.mxu1 %v36_v13  ;;  %v575_v7 = vadd.s32 4294967272, %v1124_v2  ;;  %p935_p3 = por %p934_p2, %p933_p1 }
  0x1c   :  { %828 = vmatprep.subr.msk.mxu0 %vm50_vm0, %v41_v8  ;;  %895 = vmatpush3.msra.mxu1 %v36_v13 }
  0x1d   :  { %896 = vmatprep.subr.mxu1 %v35_v14  ;;  %p936_p4 = pnand %p935_p3, %p929_p0 }
  0x1e   :  { %897 = vmatpush3.msra.mxu1 %v35_v14 }
  0x1f   :  { %829 = vmatpush3.xpose.msk.msra.mxu0 %vm50_vm0, %v41_v8  ;;  %898 = vmatprep.subr.mxu1 %v34_v15  ;;  %v559_v8 = vsub.s32 %v1124_v2, %v1126_v3 }
  0x20   :  { %830 = vmatprep.subr.msk.mxu0 %vm50_vm0, %v40_v9  ;;  %899 = vmatpush3.msra.mxu1 %v34_v15 }
  0x21   :  { %900 = vmatprep.subr.mxu1 %v33_v16 }
  0x22   :  { %901 = vmatpush3.msra.mxu1 %v33_v16 }
  0x23   :  { %831 = vmatpush3.xpose.msk.msra.mxu0 %vm50_vm0, %v40_v9  ;;  %v564_v9 = vsub.s32 %v561_v4, %v1126_v3 }
  0x24   :  { %832 = vmatprep.subr.msk.mxu0 %vm50_vm0, %v39_v10 }
  0x27   :  { %833 = vmatpush3.xpose.msk.msra.mxu0 %vm50_vm0, %v39_v10  ;;  %v950_v10 = vmov 1.0  }
  0x28   :  { %834 = vmatprep.subr.msk.mxu0 %vm50_vm0, %v38_v11 }
  0x2b   :  { %835 = vmatpush3.xpose.msk.msra.mxu0 %vm50_vm0, %v38_v11  ;;  %v571_v11 = vsub.s32 %v568_v5, %v1126_v3  ;;  %v659_v5 = vadd.s32 4294967176, %v1124_v2 }
  0x2c   :  { %836 = vmatprep.subr.msk.mxu0 %vm50_vm0, %v37_v12 }
  0x2f   :  { %837 = vmatpush3.xpose.msk.msra.mxu0 %vm50_vm0, %v37_v12  ;;  %v582_v12 = vadd.s32 4294967264, %v1124_v2 }
  0x30   :  { %838 = vmatprep.subr.msk.mxu0 %vm50_vm0, %v36_v13 }
  0x33   :  { %839 = vmatpush3.xpose.msk.msra.mxu0 %vm50_vm0, %v36_v13 }
  0x34   :  { %840 = vmatprep.subr.msk.mxu0 %vm50_vm0, %v35_v14 }
  0x37   :  { %841 = vmatpush3.xpose.msk.msra.mxu0 %vm50_vm0, %v35_v14 }
  0x38   :  { %842 = vmatprep.subr.msk.mxu0 %vm50_vm0, %v34_v15 }
  0x3b   :  { %843 = vmatpush3.xpose.msk.msra.mxu0 %vm50_vm0, %v34_v15  ;;  %v578_v15 = vsub.s32 %v575_v7, %v1126_v3 }
  0x3c   :  { %844 = vmatprep.subr.msk.mxu0 %vm50_vm0, %v33_v16 }
  0x3f   :  { %845 = vmatpush3.xpose.msk.msra.mxu0 %vm50_vm0, %v33_v16  ;;  %v589_v16 = vadd.s32 4294967256, %v1124_v2 }
  0x42   :  { %847 = vmatmul.mubr.msk.f32.vlgmr.msra.gmra.mxu0 %vm50_vm0, %v18_v17 }
  0x43   :  { %849 = vmatprep.mubr.msk.f32.mxu0 %vm50_vm0, %v19_v18 }
  0x46   :  { %850 = vmatmul.mubr.msk.f32.gmra.mxu0 %vm50_vm0, %v20_v19 }
  0x47   :  { %852 = vmatprep.mubr.msk.f32.mxu0 %vm50_vm0, %v21_v20  ;;  %v585_v20 = vsub.s32 %v582_v12, %v1126_v3 }
  0x4a   :  { %853 = vmatmul.mubr.msk.f32.gmra.mxu0 %vm50_vm0, %v22_v21  ;;  %v596_v21 = vadd.s32 4294967248, %v1124_v2 }
  0x4b   :  { %855 = vmatprep.mubr.msk.f32.mxu0 %vm50_vm0, %v23_v22 }
  0x4e   :  { %856 = vmatmul.mubr.msk.f32.gmra.mxu0 %vm50_vm0, %v24_v23 }
  0x4f   :  { %858 = vmatprep.mubr.msk.f32.mxu0 %vm50_vm0, %v25_v24 }
  0x52   :  { %859 = vmatmul.mubr.msk.f32.gmra.mxu0 %vm50_vm0, %v26_v25  ;;  %v592_v25 = vsub.s32 %v589_v16, %v1126_v3 }
  0x53   :  { %861 = vmatprep.mubr.msk.f32.mxu0 %vm50_vm0, %v27_v26 }
  0x56   :  { %862 = vmatmul.mubr.msk.f32.gmra.mxu0 %vm50_vm0, %v28_v27  ;;  %v603_v27 = vadd.s32 4294967240, %v1124_v2 }
  0x57   :  { %864 = vmatprep.mubr.msk.f32.mxu0 %vm50_vm0, %v29_v28 }
  0x5a   :  { %865 = vmatmul.mubr.msk.f32.gmra.mxu0 %vm50_vm0, %v30_v29 }
  0x5b   :  { %867 = vmatprep.mubr.msk.f32.mxu0 %vm50_vm0, %v31_v30  ;;  %v599_v30 = vsub.s32 %v596_v21, %v1126_v3 }
  0x5e   :  { %868 = vmatmul.mubr.msk.f32.gmra.mxu0 %vm50_vm0, %v32_v31  ;;  %v610_v31 = vadd.s32 4294967232, %v1124_v2 }
 0x102   :  { %v848_v32 = vpop.f32.mrf.mxu0 }
 0x103   :  { %v299_v38 = vsub.f32 %v717_v33, %v848_v32 }
 0x104   :  { %v213_v34 = vpop.f32.mrf.mxu0 }
 0x105   :  { %v298_v35 = vsub.f32 %v717_v33, %v213_v34 }
 0x106   :  { %v851_v36 = vpop.f32.mrf.mxu0 }
 0x107   :  { %314 = vmin.index.xlane.f32.xlu0 %v298_v35  ;;  %v301_v42 = vsub.f32 %v717_v33, %v851_v36  ;;  %v617_v35 = vadd.s32 4294967224, %v1124_v2 }
 0x108   :  { %v223_v37 = vpop.f32.mrf.mxu0 }
 0x109   :  { %v300_v39 = vsub.f32 %v717_v33, %v223_v37  ;;  %v606_v37 = vsub.s32 %v603_v27, %v1126_v3 }
 0x10a   :  { %v854_v40 = vpop.f32.mrf.mxu0 }
 0x10b   :  { %316 = vmin.index.xlane.f32.xlu0 %v299_v38  ;;  %318 = vmin.index.xlane.f32.xlu1 %v300_v39  ;;  %v303_v46 = vsub.f32 %v717_v33, %v854_v40  ;;  %v613_v40 = vsub.s32 %v610_v31, %v1126_v3 }
 0x10c   :  { %v233_v41 = vpop.f32.mrf.mxu0 }
 0x10d   :  { %v302_v43 = vsub.f32 %v717_v33, %v233_v41  ;;  %v624_v41 = vadd.s32 4294967216, %v1124_v2 }
 0x10e   :  { %v857_v44 = vpop.f32.mrf.mxu0 }
 0x10f   :  { %320 = vmin.index.xlane.f32.xlu1 %v301_v42  ;;  %322 = vmin.index.xlane.f32.xlu0 %v302_v43  ;;  %v305_v50 = vsub.f32 %v717_v33, %v857_v44 }
 0x110   :  { %v243_v45 = vpop.f32.mrf.mxu0 }
 0x111   :  { %v304_v47 = vsub.f32 %v717_v33, %v243_v45  ;;  %v620_v45 = vsub.s32 %v617_v35, %v1126_v3 }
 0x112   :  { %v860_v48 = vpop.f32.mrf.mxu0 }
 0x113   :  { %324 = vmin.index.xlane.f32.xlu1 %v303_v46  ;;  %326 = vmin.index.xlane.f32.xlu0 %v304_v47  ;;  %v307_v54 = vsub.f32 %v717_v33, %v860_v48  ;;  %v631_v47 = vadd.s32 4294967208, %v1124_v2 }
 0x114   :  { %v253_v49 = vpop.f32.mrf.mxu0 }
 0x115   :  { %v306_v51 = vsub.f32 %v717_v33, %v253_v49 }
 0x116   :  { %v863_v52 = vpop.f32.mrf.mxu0 }
 0x117   :  { %328 = vmin.index.xlane.f32.xlu1 %v305_v50  ;;  %330 = vmin.index.xlane.f32.xlu0 %v306_v51  ;;  %v309_v58 = vsub.f32 %v717_v33, %v863_v52  ;;  %v627_v50 = vsub.s32 %v624_v41, %v1126_v3  ;;  %v638_v51 = vadd.s32 4294967200, %v1124_v2 }
 0x118   :  { %v263_v53 = vpop.f32.mrf.mxu0 }
 0x119   :  { %v308_v55 = vsub.f32 %v717_v33, %v263_v53 }
 0x11a   :  { %v866_v56 = vpop.f32.mrf.mxu0 }
 0x11b   :  { %332 = vmin.index.xlane.f32.xlu1 %v307_v54  ;;  %334 = vmin.index.xlane.f32.xlu0 %v308_v55  ;;  %v311_v62 = vsub.f32 %v717_v33, %v866_v56  ;;  %v645_v55 = vadd.s32 4294967192, %v1124_v2 }
 0x11c   :  { %v273_v57 = vpop.f32.mrf.mxu0 }
 0x11d   :  { %v310_v59 = vsub.f32 %v717_v33, %v273_v57  ;;  %v634_v57 = vsub.s32 %v631_v47, %v1126_v3  ;;  %v648_v1 = vsub.s32 %v645_v55, %v1126_v3 }
 0x11e   :  { %v869_v60 = vpop.f32.mrf.mxu0 }
 0x11f   :  { %336 = vmin.index.xlane.f32.xlu1 %v309_v58  ;;  %338 = vmin.index.xlane.f32.xlu0 %v310_v59  ;;  %v313_v0 = vsub.f32 %v717_v33, %v869_v60  ;;  %v641_v60 = vsub.s32 %v638_v51, %v1126_v3 }
 0x120   :  { %v283_v61 = vpop.f32.mrf.mxu0 }
 0x121   :  { %v312_v63 = vsub.f32 %v717_v33, %v283_v61  ;;  %v652_v61 = vadd.s32 4294967184, %v1124_v2 }
 0x123   :  { %340 = vmin.index.xlane.f32.xlu1 %v311_v62  ;;  %342 = vmin.index.xlane.f32.xlu0 %v312_v63 }
 0x127   :  { %344 = vmin.index.xlane.f32.xlu1 %v313_v0 }
 0x190   :  { %v315_v6 = vpop.xlane.xlu0 %314 }
 0x191   :  { %vm348_vm1 = vcmp.eq.s32.totalorder %v1124_v2, %v315_v6  ;;  %v560_v17 = vrot.slane %v315_v6, %v559_v8  ;;  %v655_v8 = vsub.s32 %v652_v61, %v1126_v3 }
 0x192   :  { %902 = vmatprep.mubr.msk.f32.mxu1 %vm348_vm1, %v950_v10 }
 0x194   :  { %v317_v13 = vpop.xlane.xlu0 %316  ;;  %v319_v14 = vpop.xlane.xlu1 %318 }
 0x195   :  { %vm349_vm3 = vcmp.eq.s32.totalorder %v1124_v2, %v317_v13  ;;  %v565_v18 = vrot.slane %v317_v13, %v564_v9  ;;  %vm350_vm4 = vcmp.eq.s32.totalorder %v1124_v2, %v319_v14  ;;  %v572_v19 = vrot.slane %v319_v14, %v571_v11 }
 0x196   :  { %903 = vmatmul.mubr.msk.f32.vlgmr.msra.gmra.mxu1 %vm349_vm3, %v950_v10  ;;  %vm622_vm3 = vcmask 654912   ;;  %v662_v14 = vsub.s32 %v659_v5, %v1126_v3 }
 0x197   :  { %v567_v22 = vsel %vm566_vm2, %v565_v18, %v560_v17  ;;  %905 = vmatprep.mubr.msk.f32.mxu1 %vm350_vm4, %v950_v10  ;;  %vm615_vm2 = vcmask 589312  }
 0x198   :  { %v321_v23 = vpop.xlane.xlu1 %320  ;;  %v323_v24 = vpop.xlane.xlu0 %322  ;;  %v574_v28 = vsel %vm573_vm5, %v572_v19, %v567_v22 }
 0x199   :  { %vm351_vm7 = vcmp.eq.s32.totalorder %v1124_v2, %v321_v23  ;;  %v579_v26 = vrot.slane %v321_v23, %v578_v15  ;;  %vm352_vm8 = vcmp.eq.s32.totalorder %v1124_v2, %v323_v24  ;;  %v586_v29 = vrot.slane %v323_v24, %v585_v20 }
 0x19a   :  { %906 = vmatmul.mubr.msk.f32.gmra.mxu1 %vm351_vm7, %v950_v10  ;;  %vm636_vm7 = vcmask 786112  }
 0x19b   :  { %v581_v32 = vsel %vm580_vm6, %v579_v26, %v574_v28  ;;  %908 = vmatprep.mubr.msk.f32.mxu1 %vm352_vm8, %v950_v10  ;;  %vm629_vm6 = vcmask 720512  }
 0x19c   :  { %v325_v33 = vpop.xlane.xlu1 %324  ;;  %v327_v34 = vpop.xlane.xlu0 %326  ;;  %v588_v38 = vsel %vm587_vm9, %v586_v29, %v581_v32 }
 0x19d   :  { %vm353_vm11 = vcmp.eq.s32.totalorder %v1124_v2, %v325_v33  ;;  %v593_v36 = vrot.slane %v325_v33, %v592_v25  ;;  %vm354_vm12 = vcmp.eq.s32.totalorder %v1124_v2, %v327_v34  ;;  %v600_v39 = vrot.slane %v327_v34, %v599_v30 }
 0x19e   :  { %909 = vmatmul.mubr.msk.f32.gmra.mxu1 %vm353_vm11, %v950_v10  ;;  %vm650_vm11 = vcmask 917312  }
 0x19f   :  { %v595_v42 = vsel %vm594_vm10, %v593_v36, %v588_v38  ;;  %911 = vmatprep.mubr.msk.f32.mxu1 %vm354_vm12, %v950_v10  ;;  %vm643_vm10 = vcmask 851712  }
 0x1a0   :  { %v329_v43 = vpop.xlane.xlu1 %328  ;;  %v331_v44 = vpop.xlane.xlu0 %330  ;;  %v602_v48 = vsel %vm601_vm13, %v600_v39, %v595_v42 }
 0x1a1   :  { %vm355_vm15 = vcmp.eq.s32.totalorder %v1124_v2, %v329_v43  ;;  %v607_v46 = vrot.slane %v329_v43, %v606_v37  ;;  %vm356_vm1 = vcmp.eq.s32.totalorder %v1124_v2, %v331_v44  ;;  %v614_v49 = vrot.slane %v331_v44, %v613_v40 }
 0x1a2   :  { %912 = vmatmul.mubr.msk.f32.gmra.mxu1 %vm355_vm15, %v950_v10  ;;  %vm664_vm15 = vcmask 1048512  }
 0x1a3   :  { %v609_v52 = vsel %vm608_vm14, %v607_v46, %v602_v48  ;;  %914 = vmatprep.mubr.msk.f32.mxu1 %vm356_vm1, %v950_v10  ;;  %vm657_vm14 = vcmask 982912  }
 0x1a4   :  { %v333_v53 = vpop.xlane.xlu1 %332  ;;  %v335_v54 = vpop.xlane.xlu0 %334  ;;  %v616_v58 = vsel %vm615_vm2, %v614_v49, %v609_v52 }
 0x1a5   :  { %vm357_vm4 = vcmp.eq.s32.totalorder %v1124_v2, %v333_v53  ;;  %v621_v56 = vrot.slane %v333_v53, %v620_v45  ;;  %vm358_vm5 = vcmp.eq.s32.totalorder %v1124_v2, %v335_v54  ;;  %v628_v59 = vrot.slane %v335_v54, %v627_v50 }
 0x1a6   :  { %915 = vmatmul.mubr.msk.f32.gmra.mxu1 %vm357_vm4, %v950_v10 }
 0x1a7   :  { %v623_v62 = vsel %vm622_vm3, %v621_v56, %v616_v58  ;;  %917 = vmatprep.mubr.msk.f32.mxu1 %vm358_vm5, %v950_v10 }
 0x1a8   :  { %v337_v63 = vpop.xlane.xlu1 %336  ;;  %v339_v0 = vpop.xlane.xlu0 %338  ;;  %v630_v6 = vsel %vm629_vm6, %v628_v59, %v623_v62 }
 0x1a9   :  { %vm359_vm8 = vcmp.eq.s32.totalorder %v1124_v2, %v337_v63  ;;  %v635_v4 = vrot.slane %v337_v63, %v634_v57  ;;  %vm360_vm9 = vcmp.eq.s32.totalorder %v1124_v2, %v339_v0  ;;  %v642_v7 = vrot.slane %v339_v0, %v641_v60 }
 0x1aa   :  { %918 = vmatmul.mubr.msk.f32.gmra.mxu1 %vm359_vm8, %v950_v10 }
 0x1ab   :  { %v637_v9 = vsel %vm636_vm7, %v635_v4, %v630_v6  ;;  %920 = vmatprep.mubr.msk.f32.mxu1 %vm360_vm9, %v950_v10 }
 0x1ac   :  { %v341_v11 = vpop.xlane.xlu1 %340  ;;  %v343_v12 = vpop.xlane.xlu0 %342  ;;  %v644_v15 = vsel %vm643_vm10, %v642_v7, %v637_v9 }
 0x1ad   :  { %vm361_vm12 = vcmp.eq.s32.totalorder %v1124_v2, %v341_v11  ;;  %v649_v13 = vrot.slane %v341_v11, %v648_v1  ;;  %vm362_vm13 = vcmp.eq.s32.totalorder %v1124_v2, %v343_v12  ;;  %v656_v16 = vrot.slane %v343_v12, %v655_v8 }
 0x1ae   :  { %921 = vmatmul.mubr.msk.f32.gmra.mxu1 %vm361_vm12, %v950_v10 }
 0x1af   :  { %v651_v17 = vsel %vm650_vm11, %v649_v13, %v644_v15  ;;  %923 = vmatprep.mubr.msk.f32.mxu1 %vm362_vm13, %v950_v10 }
 0x1b0   :  { %v345_v18 = vpop.xlane.xlu1 %344  ;;  %v658_v20 = vsel %vm657_vm14, %v656_v16, %v651_v17 }
 0x1b1   :  { %vm363_vm1 = vcmp.eq.s32.totalorder %v1124_v2, %v345_v18  ;;  %v663_v19 = vrot.slane %v345_v18, %v662_v14 }
 0x1b2   :  { %924 = vmatmul.mubr.msk.f32.gmra.mxu1 %vm363_vm1, %v950_v10 }
 0x1b3   :  { %v665_v21 = vsel %vm664_vm15, %v663_v19, %v658_v20 }
 0x1b4   :  { %666 = vst [vmem:[#allocation2] sm:$0x1] %v665_v21 }
 0x1b5   :  { %939 = shalt.err (!%p936_p4)
}
 0x1b6   :  { %678 = dma.vmem_to_hbm [thread:$0]  %s676_s2, 16, %s1263_s4, [#allocation3]  }
 0x256   :  { %v904_v2 = vpop.f32.mrf.mxu1 }
 0x257   :  { %542 = vst.msk [vmem:[%s1262_s3 + $0x8] sm:$0xff] %vm50_vm0, %v904_v2 }
 0x258   :  { %v462_v3 = vpop.f32.mrf.mxu1 }
 0x259   :  { %541 = vst.msk [vmem:[%s1262_s3] sm:$0xff] %vm50_vm0, %v462_v3 }
 0x25a   :  { %v907_v10 = vpop.f32.mrf.mxu1 }
 0x25b   :  { %544 = vst.msk [vmem:[%s1262_s3 + $0x18] sm:$0xff] %vm50_vm0, %v907_v10 }
 0x25c   :  { %v472_v22 = vpop.f32.mrf.mxu1 }
 0x25d   :  { %543 = vst.msk [vmem:[%s1262_s3 + $0x10] sm:$0xff] %vm50_vm0, %v472_v22 }
 0x25e   :  { %v910_v23 = vpop.f32.mrf.mxu1 }
 0x25f   :  { %546 = vst.msk [vmem:[%s1262_s3 + $0x28] sm:$0xff] %vm50_vm0, %v910_v23 }
 0x260   :  { %v482_v24 = vpop.f32.mrf.mxu1 }
 0x261   :  { %545 = vst.msk [vmem:[%s1262_s3 + $0x20] sm:$0xff] %vm50_vm0, %v482_v24 }
 0x262   :  { %v913_v25 = vpop.f32.mrf.mxu1 }
 0x263   :  { %548 = vst.msk [vmem:[%s1262_s3 + $0x38] sm:$0xff] %vm50_vm0, %v913_v25 }
 0x264   :  { %v492_v26 = vpop.f32.mrf.mxu1 }
 0x265   :  { %547 = vst.msk [vmem:[%s1262_s3 + $0x30] sm:$0xff] %vm50_vm0, %v492_v26 }
 0x266   :  { %v916_v27 = vpop.f32.mrf.mxu1 }
 0x267   :  { %550 = vst.msk [vmem:[%s1262_s3 + $0x48] sm:$0xff] %vm50_vm0, %v916_v27 }
 0x268   :  { %v502_v28 = vpop.f32.mrf.mxu1 }
 0x269   :  { %549 = vst.msk [vmem:[%s1262_s3 + $0x40] sm:$0xff] %vm50_vm0, %v502_v28 }
 0x26a   :  { %v919_v29 = vpop.f32.mrf.mxu1 }
 0x26b   :  { %552 = vst.msk [vmem:[%s1262_s3 + $0x58] sm:$0xff] %vm50_vm0, %v919_v29 }
 0x26c   :  { %v512_v30 = vpop.f32.mrf.mxu1 }
 0x26d   :  { %551 = vst.msk [vmem:[%s1262_s3 + $0x50] sm:$0xff] %vm50_vm0, %v512_v30 }
 0x26e   :  { %v922_v31 = vpop.f32.mrf.mxu1 }
 0x26f   :  { %554 = vst.msk [vmem:[%s1262_s3 + $0x68] sm:$0xff] %vm50_vm0, %v922_v31 }
 0x270   :  { %v522_v32 = vpop.f32.mrf.mxu1 }
 0x271   :  { %553 = vst.msk [vmem:[%s1262_s3 + $0x60] sm:$0xff] %vm50_vm0, %v522_v32 }
 0x272   :  { %v925_v33 = vpop.f32.mrf.mxu1 }
 0x273   :  { %556 = vst.msk [vmem:[%s1262_s3 + $0x78] sm:$0xff] %vm50_vm0, %v925_v33 }
 0x274   :  { %v532_v34 = vpop.f32.mrf.mxu1 }
 0x275   :  { %555 = vst.msk [vmem:[%s1262_s3 + $0x70] sm:$0xff] %vm50_vm0, %v532_v34 }
 0x276   :  { %948 = dma.done.wait [#allocation3], 16  }
 0x277   :  { %949 = vsyncadd [#allocation3], 4294967280 }
 0x278   :  { %684 = vsyncpa [#allocation3], 1 }

</bundles_post_ra>
